<compile_context>
chip_gen: v7x
topology: tpu7x:2x2x1
jax: 0.10.0
libtpu: 0.0.40
codegen_flags: <defaults>
</compile_context>

<pallas_src>
import jax
import jax.numpy as jnp
from jax import lax
from jax.experimental import pallas as pl
from jax.experimental.pallas import tpu as pltpu


def ffn_kernel(x_ref, w1_ref, b1_ref, w2_ref, b2_ref, o_ref):
    # x_ref : (tm, emb)     w1_ref: (d_ff, emb)   b1_ref: (1, d_ff)
    # w2_ref: (emb, d_ff)   b2_ref: (1, emb)      o_ref : (tm, emb)
    x = x_ref[...]

    # h = x @ W1^T + b1  -- contract x dim 1 with W1 dim 1 (no host transpose).
    h = lax.dot_general(
        x, w1_ref[...],
        dimension_numbers=(((1,), (1,)), ((), ())),
        preferred_element_type=jnp.float32,
    )
    h = h + b1_ref[...].astype(jnp.float32)
    h = jnp.maximum(h, 0.0)                    # ReLU, f32 epilogue on the VPU
    # dropout: eval mode -> identity.

    # y = h @ W2^T + b2  -- h is down-cast to the weight dtype for the MXU
    # (explicit choice; a no-op for f32 weights), accumulation stays f32.
    y = lax.dot_general(
        h.astype(w2_ref.dtype), w2_ref[...],
        dimension_numbers=(((1,), (1,)), ((), ())),
        preferred_element_type=jnp.float32,
    )
    y = y + b2_ref[...].astype(jnp.float32)
    o_ref[...] = y.astype(o_ref.dtype)


def _pick_row_tile(M, target):
    """Largest row tile <= target that tiles M and satisfies the sublane rule
    (multiple of 8, or equal to M itself)."""
    if M <= target:
        return M
    t = (target // 8) * 8
    for cand in range(t, 0, -8):
        if M % cand == 0:
            return cand
    return M  # fall back: single whole-array block (equal to full dim is legal)


def feed_forward(x, w1, b1, w2, b2, *, tm=256, compute_dtype=None):
    """x: (batch, seq, emb). PyTorch nn.Linear weight layout:
    w1: (d_ff, emb), b1: (d_ff,), w2: (emb, d_ff), b2: (emb,)."""
    batch, seq, emb = x.shape
    d_ff = w1.shape[0]
    M = batch * seq

    tm_eff = _pick_row_tile(M, tm)
    grid = (M // tm_eff,)

    x2 = x.reshape(M, emb)
    b1r = b1.reshape(1, d_ff).astype(jnp.float32)
    b2r = b2.reshape(1, emb).astype(jnp.float32)

    if compute_dtype is not None:
        x2 = x2.astype(compute_dtype)
        w1 = w1.astype(compute_dtype)
        w2 = w2.astype(compute_dtype)

    out = pl.pallas_call(
        ffn_kernel,
        out_shape=jax.ShapeDtypeStruct((M, emb), x.dtype),
        grid_spec=pltpu.PrefetchScalarGridSpec(
            num_scalar_prefetch=0,
            grid=grid,
            in_specs=[
                pl.BlockSpec((tm_eff, emb), lambda i: (i, 0)),   # x row tile
                pl.BlockSpec((d_ff, emb), lambda i: (0, 0)),     # W1 (resident)
                pl.BlockSpec((1, d_ff), lambda i: (0, 0)),       # b1
                pl.BlockSpec((emb, d_ff), lambda i: (0, 0)),     # W2 (resident)
                pl.BlockSpec((1, emb), lambda i: (0, 0)),        # b2
            ],
            out_specs=pl.BlockSpec((tm_eff, emb), lambda i: (i, 0)),
        ),
        compiler_params=pltpu.CompilerParams(
            dimension_semantics=("parallel",),
            vmem_limit_bytes=64 * 1024 * 1024,
        ),
    )(x2, w1, b1r, w2, b2r)
    return out.reshape(batch, seq, emb)


def reference_ffn(x, w1, b1, w2, b2):
    h = jnp.maximum(x @ w1.T + b1, 0.0)
    return h @ w2.T + b2


if __name__ == "__main__":
    # Small shapes consistent with the module: emb_dim=32, d_ff=128.
    batch, seq, emb, d_ff = 2, 8, 32, 128
    key = jax.random.PRNGKey(0)
    kx, k1, k2, k3, k4 = jax.random.split(key, 5)

    x = jax.random.normal(kx, (batch, seq, emb), dtype=jnp.float32)
    # Deterministic parameter init (uniform, roughly matching nn.Linear scale).
    lim1 = 1.0 / (emb ** 0.5)
    lim2 = 1.0 / (d_ff ** 0.5)
    w1 = jax.random.uniform(k1, (d_ff, emb), minval=-lim1, maxval=lim1, dtype=jnp.float32)
    b1 = jax.random.uniform(k2, (d_ff,), minval=-lim1, maxval=lim1, dtype=jnp.float32)
    w2 = jax.random.uniform(k3, (emb, d_ff), minval=-lim2, maxval=lim2, dtype=jnp.float32)
    b2 = jax.random.uniform(k4, (emb,), minval=-lim2, maxval=lim2, dtype=jnp.float32)

    ref = reference_ffn(x, w1, b1, w2, b2)

    # f32 path (matches the PyTorch module's numerics).
    out = jax.block_until_ready(feed_forward(x, w1, b1, w2, b2))
    assert out.shape == (batch, seq, emb)
    assert jnp.allclose(out, ref, atol=1e-5, rtol=1e-5), "f32 mismatch vs reference"

    # bf16 weights/activations with f32 accumulation (v6e/v7x fast path).
    out_bf16 = jax.block_until_ready(
        feed_forward(x, w1, b1, w2, b2, compute_dtype=jnp.bfloat16))
    assert out_bf16.shape == (batch, seq, emb)
    assert jnp.allclose(out_bf16, ref, atol=1e-1, rtol=1e-1), "bf16 mismatch vs reference"

    print("KERNEL_OK")
</pallas_src>

<mosaic_0001>
module attributes {stable_mosaic.version = 11 : i64} {
  func.func @ffn_kernel(%arg0: i32, %arg1: memref<16x32xf32, #tpu.memory_space<vmem>>, %arg2: memref<128x32xf32, #tpu.memory_space<vmem>>, %arg3: memref<1x128xf32, #tpu.memory_space<vmem>>, %arg4: memref<32x128xf32, #tpu.memory_space<vmem>>, %arg5: memref<1x32xf32, #tpu.memory_space<vmem>>, %arg6: memref<16x32xf32, #tpu.memory_space<vmem>>) attributes {dimension_semantics = [#tpu.dimension_semantics<parallel>], iteration_bounds = array<i64: 1>, scalar_prefetch = 0 : i64, scratch_operands = 0 : i64, tpu.core_type = #tpu.core_type<tc>, window_params = [{transform_indices = @transform_0, window_bounds = array<i64: 16, 32>}, {pipeline_mode = #tpu.pipeline_mode<synchronous>, transform_indices = @transform_1, window_bounds = array<i64: 128, 32>}, {pipeline_mode = #tpu.pipeline_mode<synchronous>, transform_indices = @transform_2, window_bounds = array<i64: 1, 128>}, {pipeline_mode = #tpu.pipeline_mode<synchronous>, transform_indices = @transform_3, window_bounds = array<i64: 32, 128>}, {pipeline_mode = #tpu.pipeline_mode<synchronous>, transform_indices = @transform_4, window_bounds = array<i64: 1, 32>}, {transform_indices = @transform_5, window_bounds = array<i64: 16, 32>}]} {
    %c0 = arith.constant 0 : index
    %c0_0 = arith.constant 0 : index
    %0 = vector.load %arg1[%c0, %c0_0] : memref<16x32xf32, #tpu.memory_space<vmem>>, vector<16x32xf32>
    %c0_1 = arith.constant 0 : index
    %c0_2 = arith.constant 0 : index
    %1 = vector.load %arg2[%c0_1, %c0_2] : memref<128x32xf32, #tpu.memory_space<vmem>>, vector<128x32xf32>
    %cst = arith.constant dense<0.000000e+00> : vector<16x128xf32>
    %2 = tpu.matmul %0, %1, %cst {dimension_numbers = #tpu.dot_dimension_numbers<[1], [1], [0], [0], [0, 0, 1, 0], [], []>} : vector<16x32xf32>, vector<128x32xf32>, vector<16x128xf32> -> vector<16x128xf32>
    %c0_3 = arith.constant 0 : index
    %c0_4 = arith.constant 0 : index
    %3 = vector.load %arg3[%c0_3, %c0_4] : memref<1x128xf32, #tpu.memory_space<vmem>>, vector<1x128xf32>
    %4 = vector.broadcast %3 : vector<1x128xf32> to vector<16x128xf32>
    %5 = arith.addf %2, %4 : vector<16x128xf32>
    %cst_5 = arith.constant 0.000000e+00 : f32
    %6 = vector.broadcast %cst_5 : f32 to vector<16x128xf32>
    %7 = arith.maximumf %5, %6 : vector<16x128xf32>
    %c0_6 = arith.constant 0 : index
    %c0_7 = arith.constant 0 : index
    %8 = vector.load %arg4[%c0_6, %c0_7] : memref<32x128xf32, #tpu.memory_space<vmem>>, vector<32x128xf32>
    %cst_8 = arith.constant dense<0.000000e+00> : vector<16x32xf32>
    %9 = tpu.matmul %7, %8, %cst_8 {dimension_numbers = #tpu.dot_dimension_numbers<[1], [1], [0], [0], [0, 0, 1, 0], [], []>} : vector<16x128xf32>, vector<32x128xf32>, vector<16x32xf32> -> vector<16x32xf32>
    %c0_9 = arith.constant 0 : index
    %c0_10 = arith.constant 0 : index
    %10 = vector.load %arg5[%c0_9, %c0_10] : memref<1x32xf32, #tpu.memory_space<vmem>>, vector<1x32xf32>
    %11 = vector.broadcast %10 : vector<1x32xf32> to vector<16x32xf32>
    %12 = arith.addf %9, %11 : vector<16x32xf32>
    %c0_11 = arith.constant 0 : index
    %c0_12 = arith.constant 0 : index
    %13 = vector.load %arg6[%c0_11, %c0_12] : memref<16x32xf32, #tpu.memory_space<vmem>>, vector<16x32xf32>
    tpu.vector_store %arg6[%c0_11, %c0_12], %12 {strides = array<i32>} : memref<16x32xf32, #tpu.memory_space<vmem>>, vector<16x32xf32>,
    return
  }
  func.func @transform_0(%arg0: i32) -> (i32, i32) {
    %c0_i32 = arith.constant 0 : i32
    %c0_i32_0 = arith.constant 0 : i32
    return %arg0, %c0_i32 : i32, i32
  }
  func.func @transform_1(%arg0: i32) -> (i32, i32) {
    %c0_i32 = arith.constant 0 : i32
    %c0_i32_0 = arith.constant 0 : i32
    %c0_i32_1 = arith.constant 0 : i32
    return %c0_i32, %c0_i32_0 : i32, i32
  }
  func.func @transform_2(%arg0: i32) -> (i32, i32) {
    %c0_i32 = arith.constant 0 : i32
    %c0_i32_0 = arith.constant 0 : i32
    %c0_i32_1 = arith.constant 0 : i32
    return %c0_i32, %c0_i32_0 : i32, i32
  }
  func.func @transform_3(%arg0: i32) -> (i32, i32) {
    %c0_i32 = arith.constant 0 : i32
    %c0_i32_0 = arith.constant 0 : i32
    %c0_i32_1 = arith.constant 0 : i32
    return %c0_i32, %c0_i32_0 : i32, i32
  }
  func.func @transform_4(%arg0: i32) -> (i32, i32) {
    %c0_i32 = arith.constant 0 : i32
    %c0_i32_0 = arith.constant 0 : i32
    %c0_i32_1 = arith.constant 0 : i32
    return %c0_i32, %c0_i32_0 : i32, i32
  }
  func.func @transform_5(%arg0: i32) -> (i32, i32) {
    %c0_i32 = arith.constant 0 : i32
    %c0_i32_0 = arith.constant 0 : i32
    return %arg0, %c0_i32 : i32, i32
  }
}

</mosaic_0001>

<bundles_post_ra>
// kernel: tpu_custom_call.1
= control target key start
LH: loop header
LB: loop body
LE: loop exit
PB: predicated region body
PF: predicated region fallthrough
CT: control target
= control target key end

     0   :  { %10 = vsyncpa [#allocation3], 0  ;;  %s814_s0 = inlined_call_operand.hbm [shape: f32[16,32], index: 0, kind: input, shape index: {}]   ;;  %s815_s1 = inlined_call_operand.hbm [shape: f32[128,32], index: 1, kind: input, shape index: {}]   ;;  %s816_s2 = inlined_call_operand.hbm [shape: f32[1,128], index: 2, kind: input, shape index: {}]   ;;  %s817_s3 = inlined_call_operand.hbm [shape: f32[32,128], index: 3, kind: input, shape index: {}]   ;;  %s818_s4 = inlined_call_operand.hbm [shape: f32[1,32], index: 4, kind: input, shape index: {}]   ;;  %s819_s5 = inlined_call_operand.hbm [shape: f32[16,32], index: 5, kind: output, shape index: {}]  }
   0x1   :  { %11 = vsyncpa [#allocation6], 0 }
   0x2   :  { %12 = vsyncpa [#allocation9], 0 }
   0x3   :  { %13 = vsyncpa [#allocation4], 0  ;;  %s643_s18 = smov [#allocation5]   ;;  %s644_s20 = smov [#allocation8]  }
   0x4   :  { %s31_s19 = sshll.u32 %s643_s18, 4  ;;  %s53_s21 = sshll.u32 %s644_s20, 4  ;;  %s32_s19 = int_to_ptr.vmem [resolvable:$true] %s31_s19  ;;  %s681_s21 = int_to_ptr.vmem [resolvable:$true] %s53_s21 }
   0x5   :  { %s503_s24 = scalar_lea.hbm %s815_s1, 2048 }
   0x6   :  { %p504_p0 = scmp.ne.s32.totalorder %s815_s1, %s503_s24  ;;  %p507_p1 = scmp.lt.u32.totalorder %s503_s24, %s815_s1 }
   0x8   :  { %p509_p2 = pnand %p507_p1, %p504_p0 }
   0xa   :  { %512 = shalt.err (!%p509_p2)
}
   0xb   :  { %s513_s29 = scalar_lea.vmem %s32_s19, 2048  ;;  %p518_p4 = scmp.lt.s32.totalorder %s32_s19, %s32_s19 }
   0xc   :  { %p514_p3 = scmp.ne.s32.totalorder %s32_s19, %s513_s29  ;;  %p519_p5 = scmp.lt.s32.totalorder %s513_s29, %s513_s29 }
   0xe   :  { %p520_p6 = por %p519_p5, %p518_p4 }
  0x10   :  { %p521_p7 = pnand %p520_p6, %p514_p3 }
  0x12   :  { %524 = shalt.err (!%p521_p7)
}
  0x13   :  { %s645_s30 = smov 128   ;;  %s646_s6 = smov 8  }
  0x14   :  { %37 = dma.hbm_to_vmem [thread:$0]  %s815_s1, 2048, %s32_s19, [#allocation6], %s645_s30, %s645_s30, %s646_s6  }
  0x15   :  { %s525_s11 = scalar_lea.hbm %s817_s3, 512 }
  0x16   :  { %p526_p8 = scmp.ne.s32.totalorder %s817_s3, %s525_s11  ;;  %p529_p9 = scmp.lt.u32.totalorder %s525_s11, %s817_s3 }
  0x18   :  { %p531_p10 = pnand %p529_p9, %p526_p8 }
  0x1a   :  { %534 = shalt.err (!%p531_p10)
}
  0x1b   :  { %s535_s16 = scalar_lea.vmem %s681_s21, 512  ;;  %p540_p12 = scmp.lt.s32.totalorder %s681_s21, %s681_s21 }
  0x1c   :  { %p536_p11 = scmp.ne.s32.totalorder %s681_s21, %s535_s16  ;;  %p541_p13 = scmp.lt.s32.totalorder %s535_s16, %s535_s16 }
  0x1e   :  { %p542_p0 = por %p541_p13, %p540_p12 }
  0x20   :  { %p543_p1 = pnand %p542_p0, %p536_p11 }
  0x22   :  { %546 = shalt.err (!%p543_p1)
}
  0x23   :  { %59 = dma.hbm_to_vmem [thread:$0]  %s817_s3, 512, %s681_s21, [#allocation9], %s645_s30, %s645_s30, %s646_s6  }
  0x24   :  { %s647_s18 = smov [#allocation2]   ;;  %s648_s20 = smov [#allocation7]  }
  0x25   :  { %s19_s19 = sshll.u32 %s647_s18, 4  ;;  %s44_s22 = sshll.u32 %s648_s20, 4  ;;  %s20_s19 = int_to_ptr.vmem [resolvable:$true] %s19_s19  ;;  %s45_s22 = int_to_ptr.vmem [resolvable:$true] %s44_s22 }
  0x26   :  { %s547_s25 = scalar_lea.hbm %s814_s0, 256 }
  0x27   :  { %p548_p2 = scmp.ne.s32.totalorder %s814_s0, %s547_s25  ;;  %p551_p3 = scmp.lt.u32.totalorder %s547_s25, %s814_s0 }
  0x29   :  { %p553_p4 = pnand %p551_p3, %p548_p2 }
  0x2b   :  { %556 = shalt.err (!%p553_p4)
}
  0x2c   :  { %s557_s3 = scalar_lea.vmem %s20_s19, 256  ;;  %p562_p6 = scmp.lt.s32.totalorder %s20_s19, %s20_s19 }
  0x2d   :  { %p558_p5 = scmp.ne.s32.totalorder %s20_s19, %s557_s3  ;;  %p563_p7 = scmp.lt.s32.totalorder %s557_s3, %s557_s3 }
  0x2f   :  { %p564_p8 = por %p563_p7, %p562_p6 }
  0x31   :  { %p565_p9 = pnand %p564_p8, %p558_p5 }
  0x33   :  { %568 = shalt.err (!%p565_p9)
}
  0x34   :  { %25 = dma.hbm_to_vmem [thread:$0]  %s814_s0, 256, %s20_s19, [#allocation3], %s645_s30, %s645_s30, %s646_s6  }
  0x35   :  { %s569_s10 = scalar_lea.hbm %s816_s2, 16 }
  0x36   :  { %p570_p10 = scmp.ne.s32.totalorder %s816_s2, %s569_s10  ;;  %p573_p11 = scmp.lt.u32.totalorder %s569_s10, %s816_s2 }
  0x38   :  { %p575_p12 = pnand %p573_p11, %p570_p10 }
  0x3a   :  { %578 = shalt.err (!%p575_p12)
}
  0x3b   :  { %s579_s15 = scalar_lea.vmem %s45_s22, 16  ;;  %s583_s16 = scalar_lea.vmem %s45_s22, 32 }
  0x3c   :  { %p580_p13 = scmp.ne.s32.totalorder %s45_s22, %s579_s15  ;;  %p584_p0 = scmp.lt.s32.totalorder %s45_s22, %s45_s22 }
  0x3d   :  { %p585_p1 = scmp.lt.s32.totalorder %s583_s16, %s579_s15 }
  0x3f   :  { %p586_p2 = por %p585_p1, %p584_p0 }
  0x41   :  { %p587_p3 = pnand %p586_p2, %p580_p13 }
  0x43   :  { %590 = shalt.err (!%p587_p3)
}
  0x44   :  { %47 = dma.hbm_to_vmem [thread:$0]  %s816_s2, 16, %s45_s22, [#allocation6]  }
  0x45   :  { %s649_s17 = smov [#allocation10]   ;;  %s591_s23 = scalar_lea.hbm %s818_s4, 16 }
  0x46   :  { %s66_s18 = sshll.u32 %s649_s17, 4  ;;  %p592_p4 = scmp.ne.s32.totalorder %s818_s4, %s591_s23  ;;  %s67_s18 = int_to_ptr.vmem [resolvable:$true] %s66_s18 }
  0x47   :  { %p595_p5 = scmp.lt.u32.totalorder %s591_s23, %s818_s4 }
  0x49   :  { %p597_p6 = pnand %p595_p5, %p592_p4 }
  0x4b   :  { %600 = shalt.err (!%p597_p6)
}
  0x4c   :  { %s601_s28 = scalar_lea.vmem %s67_s18, 16  ;;  %s605_s2 = scalar_lea.vmem %s67_s18, 32 }
  0x4d   :  { %p602_p7 = scmp.ne.s32.totalorder %s67_s18, %s601_s28  ;;  %p606_p8 = scmp.lt.s32.totalorder %s67_s18, %s67_s18 }
  0x4e   :  { %p607_p9 = scmp.lt.s32.totalorder %s605_s2, %s601_s28 }
  0x50   :  { %p608_p10 = por %p607_p9, %p606_p8 }
  0x52   :  { %p609_p11 = pnand %p608_p10, %p602_p7 }
  0x54   :  { %612 = shalt.err (!%p609_p11)
}
  0x55   :  { %69 = dma.hbm_to_vmem [thread:$0]  %s818_s4, 16, %s67_s18, [#allocation9]  }
  0x56   :  { %635 = dma.done.wait [#allocation3], 256  }
  0x57   :  { %636 = vsyncadd [#allocation3], 4294967040 }
  0x58   :  { %637 = dma.done.wait [#allocation6], 2064  }
  0x59   :  { %638 = vsyncadd [#allocation6], 4294965232 }
  0x5a   :  { %639 = dma.done.wait [#allocation9], 528  }
  0x5b   :  { %640 = vsyncadd [#allocation9], 4294966768  ;;  %vm110_vm0 = vcmask 261120   ;;  %v87_v1 = vld [vmem:[#allocation5] sm:$0xff]  ;;  %v88_v2 = vld [vmem:[#allocation5 + $0x8] sm:$0xff]  ;;  %s650_s4 = smov [#allocation11]  }
  0x5c   :  { %vm759_vm1 = vmpackc.low %vm110_vm0, %vm110_vm0  ;;  %v89_v3 = vld [vmem:[#allocation5 + $0x10] sm:$0xff]  ;;  %v439_v4 = vpack.c.bf16 %v88_v2, %v87_v1  ;;  %v90_v5 = vld [vmem:[#allocation5 + $0x18] sm:$0xff]  ;;  %s335_s3 = sshll.u32 %s650_s4, 4  ;;  %s336_s3 = int_to_ptr.vmem [resolvable:$true] %s335_s3 }
  0x5d   :  { %v445_v6 = vpack.c.bf16 %v90_v5, %v89_v3  ;;  %v91_v7 = vld [vmem:[#allocation5 + $0x20] sm:$0xff]  ;;  %v92_v8 = vld [vmem:[#allocation5 + $0x28] sm:$0xff]  ;;  %v85_v9 = vld [vmem:[#allocation2] sm:$0xff]  ;;  %s613_s21 = scalar_lea.vmem %s336_s3, 256  ;;  %p618_p13 = scmp.lt.s32.totalorder %s336_s3, %s336_s3 }
  0x5e   :  { %441 = vmatprep.subr.msk.bf16.mxu0 %vm759_vm1, %v439_v4  ;;  %425 = vmatprep.mubr.msk.f32.mxu0 %vm110_vm0, %v85_v9  ;;  %v242_v10 = vld [vmem:[#allocation8] sm:$0xff]  ;;  %v243_v11 = vld [vmem:[#allocation8 + $0x8] sm:$0xff]  ;;  %v244_v12 = vld [vmem:[#allocation8 + $0x10] sm:$0xff]  ;;  %v451_v16 = vpack.c.bf16 %v92_v8, %v91_v7  ;;  %p614_p12 = scmp.ne.s32.totalorder %s336_s3, %s613_s21  ;;  %p619_p0 = scmp.lt.s32.totalorder %s613_s21, %s613_s21 }
  0x5f   :  { %444 = vmatpush3.bf16.xpose.msk.msra.mxu0 %vm759_vm1, %v439_v4  ;;  %v487_v13 = vpack.c.bf16 %v243_v11, %v242_v10  ;;  %v245_v14 = vld [vmem:[#allocation8 + $0x18] sm:$0xff]  ;;  %v93_v17 = vld [vmem:[#allocation5 + $0x30] sm:$0xff]  ;;  %v96_v21 = vld [vmem:[#allocation5 + $0x48] sm:$0xff] }
  0x60   :  { %447 = vmatprep.subr.msk.bf16.mxu0 %vm759_vm1, %v445_v6  ;;  %v491_v15 = vpack.c.bf16 %v245_v14, %v244_v12  ;;  %v94_v18 = vld [vmem:[#allocation5 + $0x38] sm:$0xff]  ;;  %v95_v20 = vld [vmem:[#allocation5 + $0x40] sm:$0xff]  ;;  %v97_v23 = vld [vmem:[#allocation5 + $0x50] sm:$0xff]  ;;  %p620_p1 = por %p619_p0, %p618_p13 }
  0x61   :  { %488 = vmatprep.subr.bf16.mxu1 %v487_v13  ;;  %v457_v19 = vpack.c.bf16 %v94_v18, %v93_v17  ;;  %v463_v22 = vpack.c.bf16 %v96_v21, %v95_v20  ;;  %v98_v24 = vld [vmem:[#allocation5 + $0x58] sm:$0xff]  ;;  %v99_v26 = vld [vmem:[#allocation5 + $0x60] sm:$0xff]  ;;  %v100_v27 = vld [vmem:[#allocation5 + $0x68] sm:$0xff] }
  0x62   :  { %490 = vmatpush3.bf16.xpose.msra.mxu1 %v487_v13  ;;  %v469_v25 = vpack.c.bf16 %v98_v24, %v97_v23  ;;  %v475_v28 = vpack.c.bf16 %v100_v27, %v99_v26  ;;  %v101_v29 = vld [vmem:[#allocation5 + $0x70] sm:$0xff]  ;;  %v102_v30 = vld [vmem:[#allocation5 + $0x78] sm:$0xff]  ;;  %v349_v33 = vld [vmem:[#allocation7] ss:$0 sm:$0xff]  ;;  %p621_p2 = pnand %p620_p1, %p614_p12 }
  0x63   :  { %492 = vmatprep.subr.bf16.mxu1 %v491_v15  ;;  %v481_v31 = vpack.c.bf16 %v102_v30, %v101_v29  ;;  %v86_v32 = vld [vmem:[#allocation2 + $0x8] sm:$0xff]  ;;  %v368_v40 = vld [vmem:[#allocation10] ss:$0 sm:$0xff] }
  0x67   :  { %450 = vmatpush3.bf16.xpose.msk.msra.mxu0 %vm759_vm1, %v445_v6 }
  0x68   :  { %453 = vmatprep.subr.msk.bf16.mxu0 %vm759_vm1, %v451_v16 }
  0x6a   :  { %494 = vmatpush3.bf16.xpose.msra.mxu1 %v491_v15 }
  0x6f   :  { %456 = vmatpush3.bf16.xpose.msk.msra.mxu0 %vm759_vm1, %v451_v16 }
  0x70   :  { %459 = vmatprep.subr.msk.bf16.mxu0 %vm759_vm1, %v457_v19 }
  0x77   :  { %462 = vmatpush3.bf16.xpose.msk.msra.mxu0 %vm759_vm1, %v457_v19 }
  0x78   :  { %465 = vmatprep.subr.msk.bf16.mxu0 %vm759_vm1, %v463_v22 }
  0x7f   :  { %468 = vmatpush3.bf16.xpose.msk.msra.mxu0 %vm759_vm1, %v463_v22 }
  0x80   :  { %471 = vmatprep.subr.msk.bf16.mxu0 %vm759_vm1, %v469_v25 }
  0x87   :  { %474 = vmatpush3.bf16.xpose.msk.msra.mxu0 %vm759_vm1, %v469_v25 }
  0x88   :  { %477 = vmatprep.subr.msk.bf16.mxu0 %vm759_vm1, %v475_v28 }
  0x8f   :  { %480 = vmatpush3.bf16.xpose.msk.msra.mxu0 %vm759_vm1, %v475_v28 }
  0x90   :  { %483 = vmatprep.subr.msk.bf16.mxu0 %vm759_vm1, %v481_v31 }
  0x97   :  { %486 = vmatpush3.bf16.xpose.msk.msra.mxu0 %vm759_vm1, %v481_v31 }
  0x9e   :  { %426 = vmatmul.mubr.msk.f32.vlgmr.msra.gmra.mrb[0].mxu0 %vm110_vm0, %v86_v32 }
 0x171   :  { %v427_v34 = vpop.f32.mrb[0].mxu0 }
 0x172   :  { %v237_v35 = vadd.f32 %v427_v34, %v349_v33  ;;  %v231_v36 = vpop.f32.mrb[1].mxu0 }
 0x173   :  { %v232_v37 = vadd.f32 %v349_v33, %v231_v36 }
 0x174   :  { %v241_v39 = vmax.f32 %v237_v35, 0.0 }
 0x175   :  { %v240_v38 = vmax.f32 %v232_v37, 0.0 }
 0x177   :  { %436 = vmatprep.mubr.f32.mxu1 %v240_v38 }
 0x178   :  { %437 = vmatmul.mubr.f32.vlgmr.msra.gmra.mrb[0].mxu1 %v241_v39 }
 0x24b   :  { %v438_v41 = vpop.f32.mrb[0].mxu1 }
 0x24c   :  { %v325_v42 = vadd.f32 %v438_v41, %v368_v40  ;;  %v319_v43 = vpop.f32.mrb[1].mxu1 }
 0x24d   :  { %v320_v44 = vadd.f32 %v368_v40, %v319_v43 }
 0x24e   :  { %329 = vst.msk [vmem:[#allocation11 + $0x8] sm:$0xff] %vm110_vm0, %v325_v42 }
 0x24f   :  { %328 = vst.msk [vmem:[#allocation11] sm:$0xff] %vm110_vm0, %v320_v44 }
 0x250   :  { %624 = shalt.err (!%p621_p2)
}
 0x251   :  { %s625_s9 = scalar_lea.hbm %s819_s5, 256 }
 0x252   :  { %p626_p3 = scmp.ne.s32.totalorder %s819_s5, %s625_s9  ;;  %p629_p4 = scmp.lt.u32.totalorder %s625_s9, %s819_s5 }
 0x254   :  { %p631_p5 = pnand %p629_p4, %p626_p3 }
 0x256   :  { %634 = shalt.err (!%p631_p5)
}
 0x257   :  { %341 = dma.vmem_to_hbm [thread:$0]  %s336_s3, 256, %s819_s5, [#allocation4], %s645_s30, %s645_s30, %s646_s6  }
 0x258   :  { %641 = dma.done.wait [#allocation4], 256  }
 0x259   :  { %642 = vsyncadd [#allocation4], 4294967040 }
 0x25a   :  { %345 = vsyncpa [#allocation3], 1 }
 0x25b   :  { %346 = vsyncpa [#allocation6], 1 }
 0x25c   :  { %347 = vsyncpa [#allocation9], 1 }
 0x25d   :  { %348 = vsyncpa [#allocation4], 1 }

</bundles_post_ra>
